<compile_context>
chip_gen: v5e
topology: v5e:2x2
jax: 0.10.0
libtpu: 0.0.40
codegen_flags: <defaults>
</compile_context>

<pallas_src>
import jax
import jax.numpy as jnp
from jax.experimental import pallas as pl
from jax.experimental.pallas import tpu as pltpu

_TARGET_TILE = 2048   # batch rows per grid step at large batch
_SPLIT_MIN = 512      # below this batch size, one tile (no v7x-split benefit)


def _round_up(v, m):
    return ((v + m - 1) // m) * m


def _pick_tile(batch):
    """Batch-tile size: multiple of 16 (bf16 sublane packing), <= _TARGET_TILE,
    and >= 2 tiles for large batches so v7x can use both TensorCores."""
    b16 = _round_up(max(batch, 1), 16)
    tile = min(_TARGET_TILE, b16)
    if b16 >= _SPLIT_MIN and b16 // tile < 2:
        tile = _round_up(tile // 2, 16)
    return tile


def dqn_kernel(x_ref, w1_ref, b1_ref, w2_ref, b2_ref, wh_ref, bh_ref, o_ref):
    # fc1 + relu (f32 accumulate + f32 epilogue, bf16 for the next MXU push)
    h1 = jnp.dot(x_ref[...], w1_ref[...], preferred_element_type=jnp.float32)
    h1 = jnp.maximum(h1 + b1_ref[...], 0.0).astype(jnp.bfloat16)
    # fc2 + relu
    h2 = jnp.dot(h1, w2_ref[...], preferred_element_type=jnp.float32)
    h2 = jnp.maximum(h2 + b2_ref[...], 0.0).astype(jnp.bfloat16)
    # fused heads: one matmul into a lane-dense (tile, 128) bf16 slab
    o_ref[...] = (jnp.dot(h2, wh_ref[...], preferred_element_type=jnp.float32)
                  + bh_ref[...]).astype(o_ref.dtype)


def prepare_params(params):
    """One-time packing: fuse fcx/fcy into a lane-dense 128-wide slab, bf16 weights."""
    hidden2, output_dim = params["wx"].shape
    head_w = max(128, pl.cdiv(2 * output_dim, 128) * 128)

    w_heads = jnp.zeros((hidden2, head_w), jnp.float32)
    w_heads = w_heads.at[:, :output_dim].set(params["wx"])
    w_heads = w_heads.at[:, output_dim:2 * output_dim].set(params["wy"])
    b_heads = jnp.zeros((1, head_w), jnp.float32)
    b_heads = b_heads.at[:, :output_dim].set(params["bx"])
    b_heads = b_heads.at[:, output_dim:2 * output_dim].set(params["by"])

    return dict(
        w1=params["w1"].astype(jnp.bfloat16), b1=params["b1"],
        w2=params["w2"].astype(jnp.bfloat16), b2=params["b2"],
        wh=w_heads.astype(jnp.bfloat16), bh=b_heads,
    )


def dqn_forward(x, prepped, output_dim):
    """x: (B, input_dim) f32. prepped: output of prepare_params().

    Returns (qx, qy), each (B, output_dim) f32 (bf16 compute precision).
    """
    B, input_dim = x.shape
    hidden1 = prepped["w1"].shape[1]
    hidden2 = prepped["w2"].shape[1]
    head_w = prepped["wh"].shape[1]

    tile = _pick_tile(B)
    B_pad = pl.cdiv(B, tile) * tile
    num_tiles = B_pad // tile

    # Stream x as bf16 (halves input HBM bytes); pad batch to a tile multiple.
    x_p = jnp.pad(x.astype(jnp.bfloat16), ((0, B_pad - B), (0, 0)))

    # Resident (non-streamed) operands: same block every grid step.
    resident = lambda a: pl.BlockSpec(a.shape, lambda i: (0, 0))

    flops = 2 * B_pad * (input_dim * hidden1 + hidden1 * hidden2 + hidden2 * head_w)
    bytes_accessed = (
        x_p.size * 2 + B_pad * head_w * 2                                   # bf16 in/out
        + (prepped["w1"].size + prepped["w2"].size + prepped["wh"].size) * 2  # bf16 weights
        + (prepped["b1"].size + prepped["b2"].size + prepped["bh"].size) * 4  # f32 biases
    )

    out = pl.pallas_call(
        dqn_kernel,
        out_shape=jax.ShapeDtypeStruct((B_pad, head_w), jnp.bfloat16),
        grid=(num_tiles,),
        in_specs=[
            pl.BlockSpec((tile, input_dim), lambda i: (i, 0)),  # x: streamed
            resident(prepped["w1"]), resident(prepped["b1"]),
            resident(prepped["w2"]), resident(prepped["b2"]),
            resident(prepped["wh"]), resident(prepped["bh"]),
        ],
        out_specs=pl.BlockSpec((tile, head_w), lambda i: (i, 0)),
        compiler_params=pltpu.CompilerParams(
            dimension_semantics=("parallel",)),
        cost_estimate=pl.CostEstimate(
            flops=flops, transcendentals=0, bytes_accessed=bytes_accessed),
    )(x_p, prepped["w1"], prepped["b1"], prepped["w2"], prepped["b2"],
      prepped["wh"], prepped["bh"])

    qx = out[:B, :output_dim].astype(jnp.float32)
    qy = out[:B, output_dim:2 * output_dim].astype(jnp.float32)
    return qx, qy


def init_params(key, input_dim, output_dim):
    """Deterministic synthetic init (matches nn.Linear shapes, transposed)."""
    ks = jax.random.split(key, 8)

    def lin(kw, kb, fan_in, fan_out):
        bound = 1.0 / jnp.sqrt(fan_in)
        w = jax.random.uniform(kw, (fan_in, fan_out), jnp.float32, -bound, bound)
        b = jax.random.uniform(kb, (1, fan_out), jnp.float32, -bound, bound)
        return w, b

    w1, b1 = lin(ks[0], ks[1], input_dim, 64)
    w2, b2 = lin(ks[2], ks[3], 64, 32)
    wx, bx = lin(ks[4], ks[5], 32, output_dim)
    wy, by = lin(ks[6], ks[7], 32, output_dim)
    return dict(w1=w1, b1=b1, w2=w2, b2=b2, wx=wx, bx=bx, wy=wy, by=by)


def dqn_ref(x, p):
    """Pure-JAX f32 reference of the PyTorch forward."""
    h1 = jnp.maximum(x @ p["w1"] + p["b1"], 0.0)
    h2 = jnp.maximum(h1 @ p["w2"] + p["b2"], 0.0)
    return h2 @ p["wx"] + p["bx"], h2 @ p["wy"] + p["by"]


if __name__ == "__main__":
    key = jax.random.PRNGKey(0)
    k_x, k_p = jax.random.split(key)

    batch, input_dim, output_dim = 2, 8, 4
    x = jax.random.normal(k_x, (batch, input_dim), jnp.float32)
    params = init_params(k_p, input_dim, output_dim)

    prepped = prepare_params(params)  # one-time weight packing (hoisted out of forward)
    qx, qy = jax.block_until_ready(dqn_forward(x, prepped, output_dim))

    # correctness vs f32 reference (kernel computes in bf16 -> loose tolerance)
    rx, ry = dqn_ref(x, params)
    assert qx.shape == (batch, output_dim) and qy.shape == (batch, output_dim)
    assert jnp.allclose(qx, rx, atol=5e-2, rtol=5e-2), "head x mismatch"
    assert jnp.allclose(qy, ry, atol=5e-2, rtol=5e-2), "head y mismatch"

    print("KERNEL_OK")
</pallas_src>

<mosaic_0001>
module attributes {stable_mosaic.version = 11 : i64} {
  func.func @dqn_kernel(%arg0: i32, %arg1: memref<16x8xbf16, #tpu.memory_space<vmem>>, %arg2: memref<8x64xbf16, #tpu.memory_space<vmem>>, %arg3: memref<1x64xf32, #tpu.memory_space<vmem>>, %arg4: memref<64x32xbf16, #tpu.memory_space<vmem>>, %arg5: memref<1x32xf32, #tpu.memory_space<vmem>>, %arg6: memref<32x128xbf16, #tpu.memory_space<vmem>>, %arg7: memref<1x128xf32, #tpu.memory_space<vmem>>, %arg8: memref<16x128xbf16, #tpu.memory_space<vmem>>) attributes {dimension_semantics = [#tpu.dimension_semantics<parallel>], iteration_bounds = array<i64: 1>, scalar_prefetch = 0 : i64, scratch_operands = 0 : i64, tpu.core_type = #tpu.core_type<tc>, window_params = [{transform_indices = @transform_0, window_bounds = array<i64: 16, 8>}, {pipeline_mode = #tpu.pipeline_mode<synchronous>, transform_indices = @transform_1, window_bounds = array<i64: 8, 64>}, {pipeline_mode = #tpu.pipeline_mode<synchronous>, transform_indices = @transform_2, window_bounds = array<i64: 1, 64>}, {pipeline_mode = #tpu.pipeline_mode<synchronous>, transform_indices = @transform_3, window_bounds = array<i64: 64, 32>}, {pipeline_mode = #tpu.pipeline_mode<synchronous>, transform_indices = @transform_4, window_bounds = array<i64: 1, 32>}, {pipeline_mode = #tpu.pipeline_mode<synchronous>, transform_indices = @transform_5, window_bounds = array<i64: 32, 128>}, {pipeline_mode = #tpu.pipeline_mode<synchronous>, transform_indices = @transform_6, window_bounds = array<i64: 1, 128>}, {transform_indices = @transform_7, window_bounds = array<i64: 16, 128>}]} {
    %c0 = arith.constant 0 : index
    %c0_0 = arith.constant 0 : index
    %0 = vector.load %arg1[%c0, %c0_0] : memref<16x8xbf16, #tpu.memory_space<vmem>>, vector<16x8xbf16>
    %c0_1 = arith.constant 0 : index
    %c0_2 = arith.constant 0 : index
    %1 = vector.load %arg2[%c0_1, %c0_2] : memref<8x64xbf16, #tpu.memory_space<vmem>>, vector<8x64xbf16>
    %cst = arith.constant dense<0.000000e+00> : vector<16x64xf32>
    %2 = tpu.matmul %0, %1, %cst {dimension_numbers = #tpu.dot_dimension_numbers<[1], [0], [0], [1], [0, 0, 1, 1], [], []>} : vector<16x8xbf16>, vector<8x64xbf16>, vector<16x64xf32> -> vector<16x64xf32>
    %c0_3 = arith.constant 0 : index
    %c0_4 = arith.constant 0 : index
    %3 = vector.load %arg3[%c0_3, %c0_4] : memref<1x64xf32, #tpu.memory_space<vmem>>, vector<1x64xf32>
    %4 = vector.broadcast %3 : vector<1x64xf32> to vector<16x64xf32>
    %5 = arith.addf %2, %4 : vector<16x64xf32>
    %cst_5 = arith.constant 0.000000e+00 : f32
    %6 = vector.broadcast %cst_5 : f32 to vector<16x64xf32>
    %7 = arith.maximumf %5, %6 : vector<16x64xf32>
    %8 = arith.truncf %7 : vector<16x64xf32> to vector<16x64xbf16>
    %c0_6 = arith.constant 0 : index
    %c0_7 = arith.constant 0 : index
    %9 = vector.load %arg4[%c0_6, %c0_7] : memref<64x32xbf16, #tpu.memory_space<vmem>>, vector<64x32xbf16>
    %cst_8 = arith.constant dense<0.000000e+00> : vector<16x32xf32>
    %10 = tpu.matmul %8, %9, %cst_8 {dimension_numbers = #tpu.dot_dimension_numbers<[1], [0], [0], [1], [0, 0, 1, 1], [], []>} : vector<16x64xbf16>, vector<64x32xbf16>, vector<16x32xf32> -> vector<16x32xf32>
    %c0_9 = arith.constant 0 : index
    %c0_10 = arith.constant 0 : index
    %11 = vector.load %arg5[%c0_9, %c0_10] : memref<1x32xf32, #tpu.memory_space<vmem>>, vector<1x32xf32>
    %12 = vector.broadcast %11 : vector<1x32xf32> to vector<16x32xf32>
    %13 = arith.addf %10, %12 : vector<16x32xf32>
    %cst_11 = arith.constant 0.000000e+00 : f32
    %14 = vector.broadcast %cst_11 : f32 to vector<16x32xf32>
    %15 = arith.maximumf %13, %14 : vector<16x32xf32>
    %16 = arith.truncf %15 : vector<16x32xf32> to vector<16x32xbf16>
    %c0_12 = arith.constant 0 : index
    %c0_13 = arith.constant 0 : index
    %17 = vector.load %arg6[%c0_12, %c0_13] : memref<32x128xbf16, #tpu.memory_space<vmem>>, vector<32x128xbf16>
    %cst_14 = arith.constant dense<0.000000e+00> : vector<16x128xf32>
    %18 = tpu.matmul %16, %17, %cst_14 {dimension_numbers = #tpu.dot_dimension_numbers<[1], [0], [0], [1], [0, 0, 1, 1], [], []>} : vector<16x32xbf16>, vector<32x128xbf16>, vector<16x128xf32> -> vector<16x128xf32>
    %c0_15 = arith.constant 0 : index
    %c0_16 = arith.constant 0 : index
    %19 = vector.load %arg7[%c0_15, %c0_16] : memref<1x128xf32, #tpu.memory_space<vmem>>, vector<1x128xf32>
    %20 = vector.broadcast %19 : vector<1x128xf32> to vector<16x128xf32>
    %21 = arith.addf %18, %20 : vector<16x128xf32>
    %22 = arith.truncf %21 : vector<16x128xf32> to vector<16x128xbf16>
    %c0_17 = arith.constant 0 : index
    %c0_18 = arith.constant 0 : index
    %23 = vector.load %arg8[%c0_17, %c0_18] : memref<16x128xbf16, #tpu.memory_space<vmem>>, vector<16x128xbf16>
    tpu.vector_store %arg8[%c0_17, %c0_18], %22 {strides = array<i32>} : memref<16x128xbf16, #tpu.memory_space<vmem>>, vector<16x128xbf16>,
    return
  }
  func.func @transform_0(%arg0: i32) -> (i32, i32) {
    %c0_i32 = arith.constant 0 : i32
    %c0_i32_0 = arith.constant 0 : i32
    return %arg0, %c0_i32 : i32, i32
  }
  func.func @transform_1(%arg0: i32) -> (i32, i32) {
    %c0_i32 = arith.constant 0 : i32
    %c0_i32_0 = arith.constant 0 : i32
    %c0_i32_1 = arith.constant 0 : i32
    return %c0_i32, %c0_i32_0 : i32, i32
  }
  func.func @transform_2(%arg0: i32) -> (i32, i32) {
    %c0_i32 = arith.constant 0 : i32
    %c0_i32_0 = arith.constant 0 : i32
    %c0_i32_1 = arith.constant 0 : i32
    return %c0_i32, %c0_i32_0 : i32, i32
  }
  func.func @transform_3(%arg0: i32) -> (i32, i32) {
    %c0_i32 = arith.constant 0 : i32
    %c0_i32_0 = arith.constant 0 : i32
    %c0_i32_1 = arith.constant 0 : i32
    return %c0_i32, %c0_i32_0 : i32, i32
  }
  func.func @transform_4(%arg0: i32) -> (i32, i32) {
    %c0_i32 = arith.constant 0 : i32
    %c0_i32_0 = arith.constant 0 : i32
    %c0_i32_1 = arith.constant 0 : i32
    return %c0_i32, %c0_i32_0 : i32, i32
  }
  func.func @transform_5(%arg0: i32) -> (i32, i32) {
    %c0_i32 = arith.constant 0 : i32
    %c0_i32_0 = arith.constant 0 : i32
    %c0_i32_1 = arith.constant 0 : i32
    return %c0_i32, %c0_i32_0 : i32, i32
  }
  func.func @transform_6(%arg0: i32) -> (i32, i32) {
    %c0_i32 = arith.constant 0 : i32
    %c0_i32_0 = arith.constant 0 : i32
    %c0_i32_1 = arith.constant 0 : i32
    return %c0_i32, %c0_i32_0 : i32, i32
  }
  func.func @transform_7(%arg0: i32) -> (i32, i32) {
    %c0_i32 = arith.constant 0 : i32
    %c0_i32_0 = arith.constant 0 : i32
    return %arg0, %c0_i32 : i32, i32
  }
}

</mosaic_0001>

<bundles_post_ra>
// kernel: tpu_custom_call.1
= control target key start
LH: loop header
LB: loop body
LE: loop exit
PB: predicated region body
PF: predicated region fallthrough
CT: control target
= control target key end

     0   :  { %vm44_vm0 = vcmask 1043456   ;;  %vm40_vm1 = vcmask 64512   ;;  %s336_s0 = inlined_call_operand.vmem [shape: bf16[16,8], index: 0, kind: input, shape index: {}]   ;;  %s337_s1 = inlined_call_operand.vmem [shape: bf16[8,64], index: 1, kind: input, shape index: {}]   ;;  %s338_s2 = inlined_call_operand.vmem [shape: f32[1,64], index: 2, kind: input, shape index: {}]   ;;  %s339_s3 = inlined_call_operand.vmem [shape: bf16[64,32], index: 3, kind: input, shape index: {}]   ;;  %s340_s4 = inlined_call_operand.vmem [shape: f32[1,32], index: 4, kind: input, shape index: {}]   ;;  %s341_s5 = inlined_call_operand.vmem [shape: bf16[32,128], index: 5, kind: input, shape index: {}]   ;;  %s342_s6 = inlined_call_operand.vmem [shape: f32[1,128], index: 6, kind: input, shape index: {}]   ;;  %s343_s7 = inlined_call_operand.hbm [shape: bf16[16,128], index: 7, kind: output, shape index: {}]  }
   0x1   :  { %v30_v0 = vld [vmem:[%s337_s1] sm:$0xf] }
   0x2   :  { %v46_v1 = vsel %vm44_vm0, %v30_v0, 0  ;;  %v213_v2 = vld [vmem:[%s336_s0] sm:$0xff] }
   0x3   :  { %55 = vmatpush.bf16.msra.mxu0 %v46_v1 }
   0x4   :  { %12 = vsyncpa [#allocation3], 0  ;;  %v217_v3 = vld [vmem:[%s339_s3 + $0x18] sm:$0xff]  ;;  %v216_v4 = vld [vmem:[%s339_s3 + $0x10] sm:$0xff]  ;;  %vm101_vm2 = vcmask 523264   ;;  %vm142_vm3 = vcmask 261120  }
   0x5   :  { %109 = vmatpush.bf16.msra.mxu1 %v217_v3  ;;  %v215_v5 = vld [vmem:[%s339_s3 + $0x8] sm:$0xff]  ;;  %v214_v6 = vld [vmem:[%s339_s3] sm:$0xff]  ;;  %s170_s22 = sshll.u32 %s343_s7, 4  ;;  %s259_s23 = smov 4   ;;  %s171_s22 = int_to_ptr.hbm [resolvable:$true] %s170_s22 }
   0x6   :  { %186 = vmatmul.msk.bf16.vlgmr.msra.gmra.mxu0 %vm40_vm1, %v213_v2  ;;  %v228_v8 = vld [vmem:[%s338_s2] ss:$0 sm:$0xff]  ;;  %v219_v15 = vld [vmem:[%s341_s5 + $0x8] sm:$0xff] }
   0x7   :  { %152 = vmatpush.bf16.msra.mxu2 %v219_v15  ;;  %v218_v16 = vld [vmem:[%s341_s5] sm:$0xff]  ;;  %s257_s5 = smov [#allocation2]  }
   0x8   :  { %v229_v18 = vld [vmem:[%s340_s4] ss:$0 sm:$0xff]  ;;  %s168_s19 = sshll.u32 %s257_s5, 4  ;;  %s258_s4 = smov 64   ;;  %s169_s19 = int_to_ptr.vmem [resolvable:$true] %s168_s19 }
   0x9   :  { %110 = vmatpush.bf16.msra.mxu1 %v216_v4  ;;  %v230_v26 = vld [vmem:[%s342_s6] ss:$0 sm:$0xff] }
   0xb   :  { %153 = vmatpush.bf16.msra.mxu2 %v218_v16 }
   0xd   :  { %111 = vmatpush.bf16.msra.mxu1 %v215_v5 }
  0x11   :  { %112 = vmatpush.bf16.msra.mxu1 %v214_v6 }
  0x83   :  { %v57_v7 = vpop.f32.mrf.mxu0 }
  0x84   :  { %v58_v9 = vadd.f32 %v228_v8, %v57_v7 }
  0x86   :  { %v62_v12 = vmax.f32 %v58_v9, 0.0 }
  0x8b   :  { %v59_v10 = vpop.f32.mrf.mxu0 }
  0x8c   :  { %v60_v11 = vadd.f32 %v228_v8, %v59_v10 }
  0x8e   :  { %v63_v13 = vmax.f32 %v60_v11, 0.0 }
  0x90   :  { %v64_v14 = vpack.c.bf16 %v63_v13, %v62_v12 }
  0x92   :  { %203 = vmatmul.msk.bf16.vlgmr.msra.gmra.mxu1 %vm101_vm2, %v64_v14 }
 0x10f   :  { %v114_v17 = vpop.f32.mrf.mxu1 }
 0x110   :  { %v115_v19 = vadd.f32 %v229_v18, %v114_v17 }
 0x112   :  { %v119_v22 = vmax.f32 %v115_v19, 0.0 }
 0x117   :  { %v116_v20 = vpop.f32.mrf.mxu1 }
 0x118   :  { %v117_v21 = vadd.f32 %v229_v18, %v116_v20 }
 0x11a   :  { %v120_v23 = vmax.f32 %v117_v21, 0.0 }
 0x11c   :  { %v121_v24 = vpack.c.bf16 %v120_v23, %v119_v22 }
 0x11e   :  { %212 = vmatmul.msk.bf16.vlgmr.msra.gmra.mxu2 %vm142_vm3, %v121_v24 }
 0x1a1   :  { %v155_v25 = vpop.f32.mrf.mxu2 }
 0x1a2   :  { %v156_v28 = vadd.f32 %v230_v26, %v155_v25 }
 0x1a9   :  { %v157_v27 = vpop.f32.mrf.mxu2 }
 0x1aa   :  { %v158_v29 = vadd.f32 %v230_v26, %v157_v27 }
 0x1ac   :  { %v223_v30 = vpack.c.bf16 %v158_v29, %v156_v28 }
 0x1ae   :  { %224 = vst [vmem:[#allocation2] sm:$0xff] %v223_v30  }
 0x1af   :  { %176 = dma.vmem_to_hbm [thread:$0]  %s169_s19, 128, %s171_s22, [#allocation3], %s258_s4, %s258_s4, %s259_s23  }
 0x1b0   :  { %255 = dma.done.wait [#allocation3], 128  }
 0x1b1   :  { %256 = vsyncadd [#allocation3], 4294967168 }
 0x1b2   :  { %181 = vsyncpa [#allocation3], 1 }

</bundles_post_ra>
